<compile_context>
chip_gen: v5e
topology: v5e:2x2
jax: 0.10.0
libtpu: 0.0.40
codegen_flags: <defaults>
</compile_context>

<pallas_src>
import functools
import math

import jax
import jax.numpy as jnp
from jax.experimental import pallas as pl
from jax.experimental.pallas import tpu as pltpu

ACT_NONE, ACT_SILU, ACT_SIGMOID = 0, 1, 2

_VSPEC = pl.BlockSpec(memory_space=pltpu.MemorySpace.VMEM)
_VMEM_LIMIT = 32 * 1024 * 1024


def _cparams(n_grid_dims):
    return pltpu.CompilerParams(
        dimension_semantics=("parallel",) * n_grid_dims,
        vmem_limit_bytes=_VMEM_LIMIT)


def _tile_rows(m):
    # Largest row tile that keeps the (8,128) block constraint satisfied.
    if m <= 512:
        return m
    for t in (512, 256, 128, 64, 32, 16, 8):
        if m % t == 0:
            return t
    return m


# ----------------------------------------------------------------------------
# Pallas kernels
# ----------------------------------------------------------------------------
def _mm_epilogue_kernel(*refs, act, has_gate, has_res):
    # refs: a (1,TM,K) bf16, w (K,N) bf16, bias (1,N) f32,
    #       [gate (1,1,K) f32], [res (1,TM,N) bf16], out (1,TM,N) bf16
    a_ref, b_ref, bias_ref = refs[0], refs[1], refs[2]
    idx = 3
    gate_ref = None
    res_ref = None
    if has_gate:
        gate_ref = refs[idx]
        idx += 1
    if has_res:
        res_ref = refs[idx]
        idx += 1
    o_ref = refs[idx]

    a = a_ref[0]
    if has_gate:
        # SE channel gate folded into the matmul prologue (1x1 projection conv).
        a = (a.astype(jnp.float32) * gate_ref[0]).astype(jnp.bfloat16)
    acc = jnp.dot(a, b_ref[...], preferred_element_type=jnp.float32)
    acc = acc + bias_ref[...]
    if act == ACT_SILU:
        acc = acc * jax.nn.sigmoid(acc)
    elif act == ACT_SIGMOID:
        acc = jax.nn.sigmoid(acc)
    if has_res:
        acc = acc + res_ref[0].astype(jnp.float32)
    o_ref[0] = acc.astype(o_ref.dtype)


def _dwconv_s1_kernel(xp_ref, w_ref, bias_ref, y_ref, pool_ref, *, ho, wo):
    # xp_ref: (1, Ho+2, Wo+2, C) padded input.  Taps formed in-kernel (no im2col).
    acc = xp_ref[:, 0:ho, 0:wo, :].astype(jnp.float32) * w_ref[0:1, :]
    for k in range(1, 9):
        kh, kw = divmod(k, 3)
        tap = xp_ref[:, kh:kh + ho, kw:kw + wo, :].astype(jnp.float32)
        acc = acc + tap * w_ref[k:k + 1, :]
    acc = acc + bias_ref[...]
    act = acc * jax.nn.sigmoid(acc)                       # SiLU
    y_ref[...] = act.astype(y_ref.dtype)
    pool = jnp.mean(act, axis=2)                          # (1, Ho, C)
    pool_ref[...] = jnp.mean(pool, axis=1, keepdims=True)  # (1, 1, C)  (SE avgpool)


def _dwconv_taps_kernel(t_ref, w_ref, bias_ref, y_ref, pool_ref):
    # Stride-2 fallback.  t_ref: (9, 1, HW, C) pre-extracted taps.
    acc = t_ref[0].astype(jnp.float32) * w_ref[0:1, :]
    for k in range(1, 9):
        acc = acc + t_ref[k].astype(jnp.float32) * w_ref[k:k + 1, :]
    acc = acc + bias_ref[...]
    act = acc * jax.nn.sigmoid(acc)
    y_ref[...] = act.astype(y_ref.dtype)
    pool_ref[...] = jnp.mean(act, axis=1, keepdims=True)   # (1, 1, C)


def _se_kernel(p_ref, w1_ref, b1_ref, w2_ref, b2_ref, o_ref):
    # avgpool result -> fc1 -> SiLU -> fc2 -> sigmoid  (single launch, all f32)
    h = jnp.dot(p_ref[...], w1_ref[...], preferred_element_type=jnp.float32)
    h = h + b1_ref[...]
    h = h * jax.nn.sigmoid(h)
    s = jnp.dot(h, w2_ref[...], preferred_element_type=jnp.float32) + b2_ref[...]
    o_ref[...] = jax.nn.sigmoid(s)


def _head_kernel(x_ref, w_ref, b_ref, wh_ref, bh_ref, o_ref):
    # 1x1 head conv + SiLU + global avgpool ('flatten') + both Linear heads fused.
    acc = jnp.dot(x_ref[0], w_ref[...], preferred_element_type=jnp.float32)
    acc = acc + b_ref[...]
    acc = acc * jax.nn.sigmoid(acc)                       # (HW, 1280)
    feat = jnp.mean(acc, axis=0, keepdims=True)           # (1, 1280)
    o_ref[0] = jnp.dot(feat, wh_ref[...],
                       preferred_element_type=jnp.float32) + bh_ref[...]


# ----------------------------------------------------------------------------
# Pallas wrappers
# ----------------------------------------------------------------------------
def matmul_bias_act(a, w, bias, act=ACT_NONE, gate=None, residual=None):
    """(B, M, K) @ (K, N) + bias, optional SE gate prologue / residual epilogue."""
    b, m, k = a.shape
    n = w.shape[1]
    tm = _tile_rows(m)
    grid = (b, m // tm)
    in_specs = [
        pl.BlockSpec((1, tm, k), lambda bi, mi: (bi, mi, 0)),
        pl.BlockSpec((k, n), lambda bi, mi: (0, 0)),
        pl.BlockSpec((1, n), lambda bi, mi: (0, 0)),
    ]
    args = [a, w, bias]
    if gate is not None:
        in_specs.append(pl.BlockSpec((1, 1, k), lambda bi, mi: (bi, 0, 0)))
        args.append(gate)
    if residual is not None:
        in_specs.append(pl.BlockSpec((1, tm, n), lambda bi, mi: (bi, mi, 0)))
        args.append(residual)
    return pl.pallas_call(
        functools.partial(_mm_epilogue_kernel, act=act,
                          has_gate=gate is not None, has_res=residual is not None),
        out_shape=jax.ShapeDtypeStruct((b, m, n), jnp.bfloat16),
        grid=grid,
        in_specs=in_specs,
        out_specs=pl.BlockSpec((1, tm, n), lambda bi, mi: (bi, mi, 0)),
        compiler_params=_cparams(2),
    )(*args)


def im2col3x3(x, stride):
    """(B, H, W, C) -> (B, Ho*Wo, 9*C) window extraction (pad=1)."""
    b, h, w, c = x.shape
    xp = jnp.pad(x, ((0, 0), (1, 1), (1, 1), (0, 0)))
    ho = (h + 2 - 3) // stride + 1
    wo = (w + 2 - 3) // stride + 1
    cols = []
    for kh in range(3):
        for kw in range(3):
            cols.append(xp[:, kh:kh + stride * ho:stride,
                           kw:kw + stride * wo:stride, :])
    a = jnp.stack(cols, axis=3).reshape(b, ho * wo, 9 * c)
    return a, ho, wo


def dwconv_s1(x, w, bias):
    """Depthwise 3x3 stride-1 + BN bias + SiLU + fused SE avgpool."""
    b, h, wsp, c = x.shape
    xp = jnp.pad(x, ((0, 0), (1, 1), (1, 1), (0, 0)))
    hp, wp = h + 2, wsp + 2
    y, pooled = pl.pallas_call(
        functools.partial(_dwconv_s1_kernel, ho=h, wo=wsp),
        out_shape=(jax.ShapeDtypeStruct((b, h, wsp, c), jnp.bfloat16),
                   jax.ShapeDtypeStruct((b, 1, c), jnp.float32)),
        grid=(b,),
        in_specs=[pl.BlockSpec((1, hp, wp, c), lambda bi: (bi, 0, 0, 0)),
                  pl.BlockSpec((9, c), lambda bi: (0, 0)),
                  pl.BlockSpec((1, c), lambda bi: (0, 0))],
        out_specs=(pl.BlockSpec((1, h, wsp, c), lambda bi: (bi, 0, 0, 0)),
                   pl.BlockSpec((1, 1, c), lambda bi: (bi, 0, 0))),
        compiler_params=_cparams(1),
    )(xp, w, bias)
    return y.reshape(b, h * wsp, c), pooled.reshape(b, c), h, wsp


def dwconv_s2(x, w, bias):
    """Depthwise 3x3 stride-2 (JAX tap extraction fallback) + BN bias + SiLU + pool."""
    b, h, wsp, c = x.shape
    xp = jnp.pad(x, ((0, 0), (1, 1), (1, 1), (0, 0)))
    ho = (h + 2 - 3) // 2 + 1
    wo = (wsp + 2 - 3) // 2 + 1
    hw = ho * wo
    taps = []
    for kh in range(3):
        for kw in range(3):
            taps.append(xp[:, kh:kh + 2 * ho:2, kw:kw + 2 * wo:2, :].reshape(b, hw, c))
    taps = jnp.stack(taps, axis=0)  # (9, B, HW, C)
    y, pooled = pl.pallas_call(
        _dwconv_taps_kernel,
        out_shape=(jax.ShapeDtypeStruct((b, hw, c), jnp.bfloat16),
                   jax.ShapeDtypeStruct((b, 1, c), jnp.float32)),
        grid=(b,),
        in_specs=[pl.BlockSpec((9, 1, hw, c), lambda bi: (0, bi, 0, 0)),
                  pl.BlockSpec((9, c), lambda bi: (0, 0)),
                  pl.BlockSpec((1, c), lambda bi: (0, 0))],
        out_specs=(pl.BlockSpec((1, hw, c), lambda bi: (bi, 0, 0)),
                   pl.BlockSpec((1, 1, c), lambda bi: (bi, 0, 0))),
        compiler_params=_cparams(1),
    )(taps, w, bias)
    return y, pooled.reshape(b, c), ho, wo


def se_gate(pooled, w1, b1, w2, b2):
    b, cexp = pooled.shape
    return pl.pallas_call(
        _se_kernel,
        out_shape=jax.ShapeDtypeStruct((b, cexp), jnp.float32),
        in_specs=[_VSPEC] * 5,
        out_specs=_VSPEC,
        compiler_params=pltpu.CompilerParams(vmem_limit_bytes=_VMEM_LIMIT),
    )(pooled, w1, b1, w2, b2)


def head_and_logits(x_flat, w, b, wh, bh):
    bsz, hw, cin = x_flat.shape
    n = wh.shape[1]
    out = pl.pallas_call(
        _head_kernel,
        out_shape=jax.ShapeDtypeStruct((bsz, 1, n), jnp.float32),
        grid=(bsz,),
        in_specs=[pl.BlockSpec((1, hw, cin), lambda bi: (bi, 0, 0)),
                  pl.BlockSpec(w.shape, lambda bi: (0, 0)),
                  pl.BlockSpec(b.shape, lambda bi: (0, 0)),
                  pl.BlockSpec(wh.shape, lambda bi: (0, 0)),
                  pl.BlockSpec(bh.shape, lambda bi: (0, 0))],
        out_specs=pl.BlockSpec((1, 1, n), lambda bi: (bi, 0, 0)),
        compiler_params=_cparams(1),
    )(x_flat, w, b, wh, bh)
    return out.reshape(bsz, n)


# ----------------------------------------------------------------------------
# Parameter construction (deterministic synthetic init — no checkpoint load)
# ----------------------------------------------------------------------------
# EfficientNetV2-S stage config (torchvision):
# (block_type, expand_ratio, kernel, stride, in_ch, out_ch, num_layers)
STAGES = [
    ("fused", 1, 3, 1, 24, 24, 2),
    ("fused", 4, 3, 2, 24, 48, 4),
    ("fused", 4, 3, 2, 48, 64, 4),
    ("mb",    4, 3, 2, 64, 128, 6),
    ("mb",    6, 3, 1, 128, 160, 9),
    ("mb",    6, 3, 2, 160, 256, 15),
]
BN_EPS = 1e-3  # torchvision efficientnet_v2_s uses BatchNorm2d(eps=1e-3)


class ParamGen:
    def __init__(self, seed=0):
        self.key = jax.random.PRNGKey(seed)

    def _next(self):
        self.key, sub = jax.random.split(self.key)
        return sub

    def conv(self, k, cin, cout):
        fan_in = k * k * cin
        return jax.random.normal(self._next(), (k, k, cin, cout),
                                 jnp.float32) * math.sqrt(2.0 / fan_in)

    def dwconv(self, k, c):
        return jax.random.normal(self._next(), (k, k, c),
                                 jnp.float32) * math.sqrt(2.0 / (k * k))

    def bn(self, c):
        # eval-mode BN (gamma=1, beta=0, mean=0, var=1) folded into (scale, bias)
        gamma = jnp.ones((c,), jnp.float32)
        beta = jnp.zeros((c,), jnp.float32)
        mean = jnp.zeros((c,), jnp.float32)
        var = jnp.ones((c,), jnp.float32)
        scale = gamma / jnp.sqrt(var + BN_EPS)
        bias = beta - mean * scale
        return scale, bias

    def se_fc(self, cin, cout):
        w = jax.random.normal(self._next(), (cin, cout),
                              jnp.float32) * math.sqrt(2.0 / cin)
        b = jnp.zeros((cout,), jnp.float32)
        return w, b

    def linear(self, cin, cout):
        bound = 1.0 / math.sqrt(cin)
        w = jax.random.uniform(self._next(), (cin, cout), jnp.float32,
                               -bound, bound)
        b = jax.random.uniform(self._next(), (cout,), jnp.float32,
                               -bound, bound)
        return w, b


def build_params(seed=0):
    pg = ParamGen(seed)

    def conv_bn(k, cin, cout):
        w = pg.conv(k, cin, cout)
        scale, bias = pg.bn(cout)
        wf = (w * scale).reshape(k * k * cin, cout).astype(jnp.bfloat16)
        return wf, bias.reshape(1, cout).astype(jnp.float32)

    def dw_bn(c):
        w = pg.dwconv(3, c)
        scale, bias = pg.bn(c)
        wf = (w * scale).reshape(9, c).astype(jnp.float32)
        return wf, bias.reshape(1, c).astype(jnp.float32)

    params = {}
    sw, sb = conv_bn(3, 3, 24)
    params["stem"] = {"w": sw, "b": sb}
    blocks = []
    for btype, er, k, s, cin, cout, num in STAGES:
        for i in range(num):
            stride = s if i == 0 else 1
            bin_ = cin if i == 0 else cout
            exp = bin_ * er
            blk = {"type": btype, "stride": stride, "cin": bin_, "cout": cout}
            if btype == "fused":
                if exp != bin_:
                    blk["w_exp"], blk["b_exp"] = conv_bn(k, bin_, exp)
                    blk["w_proj"], blk["b_proj"] = conv_bn(1, exp, cout)
                else:
                    blk["w"], blk["b"] = conv_bn(k, bin_, cout)
            else:  # MBConv
                blk["w_exp"], blk["b_exp"] = conv_bn(1, bin_, exp)
                blk["w_dw"], blk["b_dw"] = dw_bn(exp)
                sq = max(1, bin_ // 4)
                w1, b1 = pg.se_fc(exp, sq)
                w2, b2 = pg.se_fc(sq, exp)
                blk["se_w1"], blk["se_b1"] = w1, b1.reshape(1, sq)
                blk["se_w2"], blk["se_b2"] = w2, b2.reshape(1, exp)
                blk["w_proj"], blk["b_proj"] = conv_bn(1, exp, cout)
            blocks.append(blk)
    params["blocks"] = blocks
    hw_, hb_ = conv_bn(1, 256, 1280)
    wf, bf = pg.linear(1280, 7)
    wv, bv = pg.linear(1280, 7)
    params["head"] = {"w": hw_, "b": hb_,
                      "wh": jnp.concatenate([wf, wv], axis=1),              # (1280, 14)
                      "bh": jnp.concatenate([bf, bv]).reshape(1, 14)}
    return params


# ----------------------------------------------------------------------------
# Forward pass  (== EffnetModel.forward: returns (fracture_logits, vertebrae_logits))
# ----------------------------------------------------------------------------
def effnet_forward(params, x_nchw):
    # NCHW (PyTorch convention) -> NHWC bf16 for the kernels.
    x = jnp.transpose(x_nchw, (0, 2, 3, 1)).astype(jnp.bfloat16)
    b = x.shape[0]

    # Stem: Conv 3x3 s2 -> BN -> SiLU
    a, ho, wo = im2col3x3(x, stride=2)
    x = matmul_bias_act(a, params["stem"]["w"], params["stem"]["b"], act=ACT_SILU)
    x = x.reshape(b, ho, wo, -1)

    for blk in params["blocks"]:
        h, w = x.shape[1], x.shape[2]
        use_res = blk["stride"] == 1 and blk["cin"] == blk["cout"]
        res = x.reshape(b, h * w, -1) if use_res else None

        if blk["type"] == "fused":
            a, ho, wo = im2col3x3(x, blk["stride"])
            if "w_proj" in blk:  # expansion + 1x1 projection
                hdn = matmul_bias_act(a, blk["w_exp"], blk["b_exp"], act=ACT_SILU)
                out = matmul_bias_act(hdn, blk["w_proj"], blk["b_proj"],
                                      act=ACT_NONE, residual=res)
            else:  # expand_ratio == 1: single 3x3 conv (+ residual)
                out = matmul_bias_act(a, blk["w"], blk["b"],
                                      act=ACT_SILU, residual=res)
            x = out.reshape(b, ho, wo, -1)
        else:  # MBConv
            a = x.reshape(b, h * w, -1)
            hdn = matmul_bias_act(a, blk["w_exp"], blk["b_exp"], act=ACT_SILU)
            hdn = hdn.reshape(b, h, w, -1)
            if blk["stride"] == 1:
                y, pooled, ho, wo = dwconv_s1(hdn, blk["w_dw"], blk["b_dw"])
            else:
                y, pooled, ho, wo = dwconv_s2(hdn, blk["w_dw"], blk["b_dw"])
            gate = se_gate(pooled, blk["se_w1"], blk["se_b1"],
                           blk["se_w2"], blk["se_b2"]).reshape(b, 1, -1)
            out = matmul_bias_act(y, blk["w_proj"], blk["b_proj"], act=ACT_NONE,
                                  gate=gate, residual=res)
            x = out.reshape(b, ho, wo, -1)

    # Head: Conv 1x1 -> BN -> SiLU -> avgpool ('flatten') -> both Linear(1280,7)
    h, w = x.shape[1], x.shape[2]
    logits = head_and_logits(x.reshape(b, h * w, -1),
                             params["head"]["w"], params["head"]["b"],
                             params["head"]["wh"], params["head"]["bh"])
    return logits[:, :7], logits[:, 7:]


if __name__ == "__main__":
    # TODO(synk): pretrained EfficientNet_V2_S weights and the TensorBoard
    # add_graph side effect are not reproducible in-script; deterministic
    # synthetic parameters are used instead.
    key = jax.random.PRNGKey(0)
    x = jax.random.normal(key, (2, 3, 32, 32), jnp.float32)  # NCHW like PyTorch
    params = build_params(seed=0)
    frac, vert = effnet_forward(params, x)
    jax.block_until_ready((frac, vert))
    assert frac.shape == (2, 7) and vert.shape == (2, 7)
    assert bool(jnp.all(jnp.isfinite(frac))) and bool(jnp.all(jnp.isfinite(vert)))
    print("KERNEL_OK")
</pallas_src>

<mosaic_0001>
module attributes {stable_mosaic.version = 11 : i64} {
  func.func @_mm_epilogue_kernel(%arg0: i32, %arg1: i32, %arg2: memref<1x256x27xbf16, #tpu.memory_space<vmem>>, %arg3: memref<27x24xbf16, #tpu.memory_space<vmem>>, %arg4: memref<1x24xf32, #tpu.memory_space<vmem>>, %arg5: memref<1x256x24xbf16, #tpu.memory_space<vmem>>) attributes {dimension_semantics = [#tpu.dimension_semantics<parallel>, #tpu.dimension_semantics<parallel>], iteration_bounds = array<i64: 2, 1>, scalar_prefetch = 0 : i64, scratch_operands = 0 : i64, tpu.core_type = #tpu.core_type<tc>, window_params = [{transform_indices = @transform_0, window_bounds = array<i64: 1, 256, 27>}, {pipeline_mode = #tpu.pipeline_mode<synchronous>, transform_indices = @transform_1, window_bounds = array<i64: 27, 24>}, {pipeline_mode = #tpu.pipeline_mode<synchronous>, transform_indices = @transform_2, window_bounds = array<i64: 1, 24>}, {transform_indices = @transform_3, window_bounds = array<i64: 1, 256, 24>}]} {
    %c0 = arith.constant 0 : index
    %c0_0 = arith.constant 0 : index
    %c0_1 = arith.constant 0 : index
    %0 = vector.load %arg2[%c0, %c0_0, %c0_1] : memref<1x256x27xbf16, #tpu.memory_space<vmem>>, vector<1x256x27xbf16>
    %1 = vector.shape_cast %0 : vector<1x256x27xbf16> to vector<256x27xbf16>
    %c0_2 = arith.constant 0 : index
    %c0_3 = arith.constant 0 : index
    %2 = vector.load %arg3[%c0_2, %c0_3] : memref<27x24xbf16, #tpu.memory_space<vmem>>, vector<27x24xbf16>
    %cst = arith.constant dense<0.000000e+00> : vector<256x24xf32>
    %3 = tpu.matmul %1, %2, %cst {dimension_numbers = #tpu.dot_dimension_numbers<[1], [0], [0], [1], [0, 0, 1, 1], [], []>} : vector<256x27xbf16>, vector<27x24xbf16>, vector<256x24xf32> -> vector<256x24xf32>
    %c0_4 = arith.constant 0 : index
    %c0_5 = arith.constant 0 : index
    %4 = vector.load %arg4[%c0_4, %c0_5] : memref<1x24xf32, #tpu.memory_space<vmem>>, vector<1x24xf32>
    %5 = vector.broadcast %4 : vector<1x24xf32> to vector<256x24xf32>
    %6 = arith.addf %3, %5 : vector<256x24xf32>
    %7 = arith.negf %6 : vector<256x24xf32>
    %8 = math.exp %7 : vector<256x24xf32>
    %cst_6 = arith.constant 1.000000e+00 : f32
    %9 = vector.broadcast %cst_6 : f32 to vector<256x24xf32>
    %10 = arith.addf %9, %8 : vector<256x24xf32>
    %11 = arith.divf %9, %10 : vector<256x24xf32>
    %12 = arith.mulf %6, %11 : vector<256x24xf32>
    %13 = arith.truncf %12 : vector<256x24xf32> to vector<256x24xbf16>
    %c0_7 = arith.constant 0 : index
    %c0_8 = arith.constant 0 : index
    %c0_9 = arith.constant 0 : index
    %14 = vector.load %arg5[%c0_7, %c0_8, %c0_9] : memref<1x256x24xbf16, #tpu.memory_space<vmem>>, vector<1x256x24xbf16>
    %15 = vector.shape_cast %14 : vector<1x256x24xbf16> to vector<256x24xbf16>
    %16 = vector.shape_cast %13 : vector<256x24xbf16> to vector<1x256x24xbf16>
    tpu.vector_store %arg5[%c0_7, %c0_8, %c0_9], %16 {strides = array<i32>} : memref<1x256x24xbf16, #tpu.memory_space<vmem>>, vector<1x256x24xbf16>,
    return
  }
  func.func @transform_0(%arg0: i32, %arg1: i32) -> (i32, i32, i32) {
    %c0_i32 = arith.constant 0 : i32
    %c0_i32_0 = arith.constant 0 : i32
    return %arg0, %arg1, %c0_i32 : i32, i32, i32
  }
  func.func @transform_1(%arg0: i32, %arg1: i32) -> (i32, i32) {
    %c0_i32 = arith.constant 0 : i32
    %c0_i32_0 = arith.constant 0 : i32
    %c0_i32_1 = arith.constant 0 : i32
    return %c0_i32, %c0_i32_0 : i32, i32
  }
  func.func @transform_2(%arg0: i32, %arg1: i32) -> (i32, i32) {
    %c0_i32 = arith.constant 0 : i32
    %c0_i32_0 = arith.constant 0 : i32
    %c0_i32_1 = arith.constant 0 : i32
    return %c0_i32, %c0_i32_0 : i32, i32
  }
  func.func @transform_3(%arg0: i32, %arg1: i32) -> (i32, i32, i32) {
    %c0_i32 = arith.constant 0 : i32
    %c0_i32_0 = arith.constant 0 : i32
    return %arg0, %arg1, %c0_i32 : i32, i32, i32
  }
}

</mosaic_0001>

<bundles_post_ra>
// kernel: tpu_custom_call.1
= control target key start
LH: loop header
LB: loop body
LE: loop exit
PB: predicated region body
PF: predicated region fallthrough
CT: control target
= control target key end

     0   :  { %s1636_s12 = smov 0   ;;  %s1638_s13 = smov 0   ;;  %s2364_s0 = inlined_call_operand.vmem [shape: bf16[2,256,27], index: 0, kind: input, shape index: {}]   ;;  %s2365_s1 = inlined_call_operand.vmem [shape: bf16[27,24], index: 1, kind: input, shape index: {}]   ;;  %s2366_s2 = inlined_call_operand.vmem [shape: f32[1,24], index: 2, kind: input, shape index: {}]   ;;  %s2367_s3 = inlined_call_operand.vmem [shape: bf16[2,256,24], index: 3, kind: output, shape index: {}]  }
   0x1   :  { %s1640_s14 = smov 0  }
   0x2 LB: > { %s25_s15 = sadd.s32 1, %s1609_s13  ;;  %p1283_p0 = scmp.ge.s32.totalorder %s1613_s14, 1  ;;  %s1613_s14 = sphi %s1640_s14, %s13_s14   ;;  %s1609_s13 = sphi %s1638_s13, %s2411_s13   ;;  %s1605_s12 = sphi %s1636_s12, %s2410_s12  }
   0x3   : > { %p27_p1 = scmp.ge.s32.totalorder %s25_s15, 2  ;;  %p158_p2 = scmp.lt.s32.totalorder %s1613_s14, 3 }
   0x5   : > { %s2413_s15 = smov (%p27_p1, %s25_s15), 0  ;;  %p159_p3 = pnand %p1283_p0, %p158_p2 }
   0x6   : > { %p191_p4 = scmp.lt.s32.totalorder (!%p159_p3), %s1605_s12, 1 }
   0x7   : > { %162 = sbr.rel (%p159_p3) target bundleno = 324 (0x144), region = 32 }
   0xc   : > { %v1358_v0 = vld [vmem:[%s2365_s1 + $0x8] sm:$0xf]  ;;  %v1429_v1 = vld [vmem:[%s2365_s1 + $0x8] sm:$0x30]  ;;  %vm391_vm0 = vcmask 1044480   ;;  %vm392_vm1 = vcmask 1045504  }
   0xd   : > { %v1359_v2 = vor.u32 %v1429_v1, %v1358_v0  ;;  %v1615_v3 = vmov 65535   ;;  %s2415_s12 = smov (!%p191_p4, %s1605_s12), 1  ;;  %v1428_v7 = vld [vmem:[%s2365_s1] sm:$0xff]  ;;  %vm342_vm2 = vcmask 220160   ;;  %vm1159_vm8 = vcmask 191488  }
   0xe   : > { %v393_v4 = vsel %vm391_vm0, 4294967295, %v1615_v3  ;;  %s1410_s20 = sshll.u32 %s2415_s12, 7  ;;  %v1708_v24 = vld [vmem:[%s2366_s2] ss:$0 sm:$0xff] }
   0xf   : > { %v394_v5 = vsel %vm392_vm1, %v393_v4, 0  ;;  %s1671_s25 = scalar_lea.vmem %s2364_s0, %s1410_s20  ;;  %s1824_s30 = scalar_lea.vmem %s2367_s3, %s1410_s20 }
  0x10   : > { %v396_v6 = vand.u32 %v1359_v2, %v394_v5  ;;  %v1412_v8 = vld [vmem:[%s1671_s25] sm:$0xff]  ;;  %v1413_v12 = vld [vmem:[%s1671_s25 + $0x8] sm:$0xff]  ;;  %v1414_v16 = vld [vmem:[%s1671_s25 + $0x10] sm:$0xff] }
  0x11   : > { %v1416_v9 = vld [vmem:[%s1671_s25 + $0x20] sm:$0xff]  ;;  %v1417_v13 = vld [vmem:[%s1671_s25 + $0x28] sm:$0xff]  ;;  %v1418_v17 = vld [vmem:[%s1671_s25 + $0x30] sm:$0xff] }
  0x12   : > { %404 = vmatpush.bf16.msra.mxu0 %v396_v6  ;;  %1430 = vmatpush.bf16.msra.mxu1 %v396_v6  ;;  %v1420_v10 = vld [vmem:[%s1671_s25 + $0x40] sm:$0xff]  ;;  %v1421_v14 = vld [vmem:[%s1671_s25 + $0x48] sm:$0xff]  ;;  %v1422_v18 = vld [vmem:[%s1671_s25 + $0x50] sm:$0xff] }
  0x13   : > { %1431 = vmatpush.bf16.msra.mxu2 %v396_v6  ;;  %1432 = vmatpush.bf16.msra.mxu3 %v396_v6  ;;  %v1424_v11 = vld [vmem:[%s1671_s25 + $0x60] sm:$0xff]  ;;  %v1425_v15 = vld [vmem:[%s1671_s25 + $0x68] sm:$0xff]  ;;  %v1426_v19 = vld [vmem:[%s1671_s25 + $0x70] sm:$0xff] }
  0x14   : > { %v1415_v20 = vld [vmem:[%s1671_s25 + $0x18] sm:$0xff] }
  0x15   : > { %v1419_v21 = vld [vmem:[%s1671_s25 + $0x38] sm:$0xff] }
  0x16   : > { %405 = vmatpush.bf16.msra.mxu0 %v1428_v7  ;;  %1433 = vmatpush.bf16.msra.mxu1 %v1428_v7  ;;  %v1423_v22 = vld [vmem:[%s1671_s25 + $0x58] sm:$0xff] }
  0x17   : > { %1434 = vmatpush.bf16.msra.mxu2 %v1428_v7  ;;  %1435 = vmatpush.bf16.msra.mxu3 %v1428_v7  ;;  %v1427_v23 = vld [vmem:[%s1671_s25 + $0x78] sm:$0xff] }
  0x19   : > { %1360 = vmatmul.msk.bf16.vlgmr.msra.gmra.mxu0 %vm342_vm2, %v1412_v8  ;;  %1364 = vmatmul.msk.bf16.vlgmr.msra.gmra.mxu1 %vm342_vm2, %v1416_v9 }
  0x1a   : > { %1368 = vmatmul.msk.bf16.vlgmr.msra.gmra.mxu2 %vm342_vm2, %v1420_v10  ;;  %1372 = vmatmul.msk.bf16.vlgmr.msra.gmra.mxu3 %vm342_vm2, %v1424_v11 }
  0x29   : > { %1361 = vmatmul.msk.bf16.gmra.mxu0 %vm342_vm2, %v1413_v12  ;;  %1365 = vmatmul.msk.bf16.gmra.mxu1 %vm342_vm2, %v1417_v13 }
  0x2a   : > { %1369 = vmatmul.msk.bf16.gmra.mxu2 %vm342_vm2, %v1421_v14  ;;  %1373 = vmatmul.msk.bf16.gmra.mxu3 %vm342_vm2, %v1425_v15 }
  0x39   : > { %1362 = vmatmul.msk.bf16.gmra.mxu0 %vm342_vm2, %v1414_v16  ;;  %1366 = vmatmul.msk.bf16.gmra.mxu1 %vm342_vm2, %v1418_v17 }
  0x3a   : > { %1370 = vmatmul.msk.bf16.gmra.mxu2 %vm342_vm2, %v1422_v18  ;;  %1374 = vmatmul.msk.bf16.gmra.mxu3 %vm342_vm2, %v1426_v19 }
  0x49   : > { %1363 = vmatmul.msk.bf16.gmra.mxu0 %vm342_vm2, %v1415_v20  ;;  %1367 = vmatmul.msk.bf16.gmra.mxu1 %vm342_vm2, %v1419_v21 }
  0x4a   : > { %1371 = vmatmul.msk.bf16.gmra.mxu2 %vm342_vm2, %v1423_v22  ;;  %1375 = vmatmul.msk.bf16.gmra.mxu3 %vm342_vm2, %v1427_v23 }
  0x96   : > { %v407_v25 = vpop.f32.mrf.mxu0  ;;  %v427_v26 = vpop.f32.mrf.mxu1 }
  0x97   : > { %v1711_v27 = vadd.f32 %v1708_v24, %v407_v25  ;;  %v1714_v28 = vadd.f32 %v1708_v24, %v427_v26 }
  0x99   : > { %v1376_v29 = vmul.f32 -1.442695, %v1711_v27  ;;  %v1384_v30 = vmul.f32 -1.442695, %v1714_v28 }
  0x9b   : > { %1462 = vpow2.f32 %v1376_v29 }
  0x9c   : > { %1464 = vpow2.f32 %v1384_v30 }
  0x9d   : > { %v447_v31 = vpop.f32.mrf.mxu2  ;;  %v467_v32 = vpop.f32.mrf.mxu3 }
  0x9e   : > { %v1719_v33 = vadd.f32 %v1708_v24, %v447_v31  ;;  %v1722_v34 = vadd.f32 %v1708_v24, %v467_v32  ;;  %v409_v35 = vpop.f32.mrf.mxu0  ;;  %v429_v36 = vpop.f32.mrf.mxu1 }
  0x9f   : > { %v1725_v37 = vadd.f32 %v1708_v24, %v409_v35  ;;  %v1728_v38 = vadd.f32 %v1708_v24, %v429_v36 }
  0xa0   : > { %v1392_v39 = vmul.f32 -1.442695, %v1719_v33  ;;  %v1400_v40 = vmul.f32 -1.442695, %v1722_v34 }
  0xa1   : > { %v1463_v41 = vpop.eup %1462  ;;  %v1377_v44 = vmul.f32 -1.442695, %v1725_v37  ;;  %v1385_v46 = vmul.f32 -1.442695, %v1728_v38 }
  0xa2   : > { %v1465_v42 = vpop.eup %1464  ;;  %v1732_v43 = vadd.f32 1.0, %v1463_v41  ;;  %1466 = vpow2.f32 %v1392_v39 }
  0xa3   : > { %v1735_v45 = vadd.f32 1.0, %v1465_v42  ;;  %1468 = vpow2.f32 %v1400_v40 }
  0xa4   : > { %1470 = vrcp.f32 %v1732_v43  ;;  %v624_v51 = vand.u32 2147483647, %v1732_v43  ;;  %v626_v52 = vand.u32 2147483648, %v1732_v43  ;;  %vm620_vm3 = vweird.f32 %v1732_v43 }
  0xa5   : > { %1472 = vrcp.f32 %v1735_v45  ;;  %v449_v47 = vpop.f32.mrf.mxu2  ;;  %v469_v48 = vpop.f32.mrf.mxu3  ;;  %v744_v55 = vand.u32 2147483647, %v1735_v45  ;;  %v746_v59 = vand.u32 2147483648, %v1735_v45  ;;  %vm740_vm4 = vweird.f32 %v1735_v45 }
  0xa6   : > { %1474 = vpow2.f32 %v1377_v44  ;;  %v1741_v49 = vadd.f32 %v1708_v24, %v449_v47  ;;  %v412_v50 = vpop.f32.mrf.mxu0  ;;  %v432_v53 = vpop.f32.mrf.mxu1  ;;  %v1748_v57 = vadd.f32 %v1708_v24, %v469_v48  ;;  %vm1764_vm5 = vcmp.eq.f32.partialorder %v624_v51, 8.507059e+37 }
  0xa7   : > { %1476 = vpow2.f32 %v1385_v46  ;;  %v1754_v61 = vadd.f32 %v1708_v24, %v412_v50  ;;  %v1761_v0 = vadd.f32 %v1708_v24, %v432_v53  ;;  %v627_v4 = vor.u32 1.1754944e-38, %v626_v52 }
  0xa8   : > { %v1467_v54 = vpop.eup %1466  ;;  %v1393_v56 = vmul.f32 -1.442695, %v1741_v49  ;;  %vm1770_vm6 = vcmp.eq.f32.partialorder %v744_v55, 8.507059e+37  ;;  %v1401_v8 = vmul.f32 -1.442695, %v1748_v57  ;;  %v747_v11 = vor.u32 1.1754944e-38, %v746_v59 }
  0xa9   : > { %v1469_v58 = vpop.eup %1468  ;;  %v1751_v60 = vadd.f32 1.0, %v1467_v54  ;;  %v1777_v12 = vmul.f32 -1.442695, %v1754_v61  ;;  %v1781_v15 = vmul.f32 -1.442695, %v1761_v0 }
  0xaa   : > { %v1471_v62 = vpop.eup %1470  ;;  %v1758_v63 = vadd.f32 1.0, %v1469_v58 }
  0xab   : > { %v1473_v1 = vpop.eup %1472  ;;  %v616_v2 = vmul.f32 %v1471_v62, %v1732_v43  ;;  %1478 = vrcp.f32 %v1751_v60  ;;  %vm621_vm7 = vweird.f32 %v1471_v62  ;;  %v864_v14 = vand.u32 2147483647, %v1751_v60 }
  0xac   : > { %v1475_v5 = vpop.eup %1474  ;;  %v736_v6 = vmul.f32 %v1473_v1, %v1735_v45  ;;  %1480 = vpow2.f32 %v1393_v56  ;;  %v866_v17 = vand.u32 2147483648, %v1751_v60  ;;  %vm741_vm9 = vweird.f32 %v1473_v1  ;;  %vm622_vm11 = vmor %vm620_vm3, %vm621_vm7 }
  0xad   : > { %v1477_v9 = vpop.eup %1476  ;;  %v617_v10 = vsub.f32 1.0, %v616_v2  ;;  %1482 = vrcp.f32 %v1758_v63  ;;  %v1784_v18 = vadd.f32 1.0, %v1475_v5  ;;  %v984_v21 = vand.u32 2147483647, %v1758_v63  ;;  %v452_v32 = vpop.f32.mrf.mxu2  ;;  %vm742_vm14 = vmor %vm740_vm4, %vm741_vm9 }
  0xae   : > { %v737_v13 = vsub.f32 1.0, %v736_v6  ;;  %v1786_v19 = vadd.f32 1.0, %v1477_v9  ;;  %1484 = vpow2.f32 %v1401_v8  ;;  %vm860_vm10 = vweird.f32 %v1751_v60 }
  0xaf   : > { %v618_v16 = vmul.f32 %v1471_v62, %v617_v10  ;;  %v986_v25 = vand.u32 2147483648, %v1758_v63  ;;  %1486 = vrcp.f32 %v1784_v18  ;;  %vm1796_vm12 = vcmp.eq.f32.partialorder %v864_v14, 8.507059e+37 }
  0xb0   : > { %v738_v20 = vmul.f32 %v1473_v1, %v737_v13  ;;  %vm980_vm13 = vweird.f32 %v1758_v63  ;;  %v867_v39 = vor.u32 1.1754944e-38, %v866_v17  ;;  %v639_v40 = vand.u32 2147483647, %v1784_v18 }
  0xb1   : > { %v1479_v22 = vpop.eup %1478  ;;  %v619_v23 = vadd.f32 %v1471_v62, %v618_v16  ;;  %1488 = vrcp.f32 %v1786_v19  ;;  %vm1809_vm15 = vcmp.eq.f32.partialorder %v984_v21, 8.507059e+37  ;;  %v987_v48 = vor.u32 1.1754944e-38, %v986_v25 }
  0xb2   : > { %v1481_v26 = vpop.eup %1480  ;;  %v739_v29 = vadd.f32 %v1473_v1, %v738_v20  ;;  %v856_v30 = vmul.f32 %v1479_v22, %v1751_v60  ;;  %v1817_v50 = vadd.f32 %v1708_v24, %v452_v32  ;;  %vm861_vm0 = vweird.f32 %v1479_v22 }
  0xb3   : > { %v1483_v35 = vpop.eup %1482  ;;  %v623_v36 = vsel %vm622_vm11, %v1471_v62, %v619_v23  ;;  %vm635_vm1 = vweird.f32 %v1784_v18  ;;  %v641_v56 = vand.u32 2147483648, %v1784_v18  ;;  %v1829_v58 = vadd.f32 1.0, %v1481_v26  ;;  %vm862_vm4 = vmor %vm860_vm10, %vm861_vm0 }
  0xb4   : > { %v628_v41 = vsel %vm1764_vm5, %v627_v4, %v623_v36  ;;  %v743_v42 = vsel %vm742_vm14, %v1473_v1, %v739_v29  ;;  %v857_v43 = vsub.f32 1.0, %v856_v30  ;;  %v976_v44 = vmul.f32 %v1483_v35, %v1758_v63  ;;  %v1485_v51 = vpop.eup %1484  ;;  %v472_v36 = vpop.f32.mrf.mxu3 }
  0xb5   : > { %v1095_v47 = vmul.f32 %v628_v41, %v1711_v27  ;;  %v748_v45 = vsel %vm1770_vm6, %v747_v11, %v743_v42  ;;  %v1487_v54 = vpop.eup %1486  ;;  %vm981_vm2 = vweird.f32 %v1483_v35  ;;  %vm1832_vm3 = vcmp.eq.f32.partialorder %v639_v40, 8.507059e+37 }
  0xb6   : > { %v1103_v52 = vmul.f32 %v748_v45, %v1714_v28  ;;  %v858_v53 = vmul.f32 %v1479_v22, %v857_v43  ;;  %v977_v27 = vsub.f32 1.0, %v976_v44  ;;  %v631_v2 = vmul.f32 %v1487_v54, %v1784_v18  ;;  %vm982_vm6 = vmor %vm980_vm13, %vm981_vm2  ;;  %v414_v44 = vpop.f32.mrf.mxu0 }
  0xb7   : > { %v1127_v55 = vpack.c.bf16 %v1095_v47, %v1095_v47  ;;  %v1489_v3 = vpop.eup %1488  ;;  %vm755_vm5 = vweird.f32 %v1786_v19  ;;  %v759_v4 = vand.u32 2147483647, %v1786_v19  ;;  %1490 = vrcp.f32 %v1829_v58 }
  0xb8   : > { %v1135_v59 = vpack.c.bf16 %v1103_v52, %v1103_v52  ;;  %v859_v62 = vadd.f32 %v1479_v22, %v858_v53  ;;  %v978_v1 = vmul.f32 %v1483_v35, %v977_v27  ;;  %v1844_v5 = vadd.f32 1.0, %v1485_v51 }
  0xb9   : > { %1160 = vst.msk [vmem:[%s1824_s30] sm:$0xf] %vm1159_vm8, %v1127_v55  ;;  %v632_v8 = vsub.f32 1.0, %v631_v2  ;;  %v751_v9 = vmul.f32 %v1489_v3, %v1786_v19  ;;  %vm636_vm7 = vweird.f32 %v1487_v54  ;;  %vm756_vm9 = vweird.f32 %v1489_v3 }
  0xba   : > { %1168 = vst.msk [vmem:[%s1824_s30 + $0x20] sm:$0xf] %vm1159_vm8, %v1135_v59  ;;  %v863_v6 = vsel %vm862_vm4, %v1479_v22, %v859_v62  ;;  %v979_v7 = vadd.f32 %v1483_v35, %v978_v1  ;;  %v761_v60 = vand.u32 2147483648, %v1786_v19  ;;  %v879_v20 = vand.u32 2147483647, %v1829_v58  ;;  %vm637_vm10 = vmor %vm635_vm1, %vm636_vm7 }
  0xbb   : > { %v868_v10 = vsel %vm1796_vm12, %v867_v39, %v863_v6  ;;  %v633_v14 = vmul.f32 %v1487_v54, %v632_v8  ;;  %v752_v16 = vsub.f32 1.0, %v751_v9  ;;  %v881_v21 = vand.u32 2147483648, %v1829_v58  ;;  %vm757_vm13 = vmor %vm755_vm5, %vm756_vm9 }
  0xbc   : > { %v1111_v11 = vmul.f32 %v868_v10, %v1719_v33  ;;  %v983_v13 = vsel %vm982_vm6, %v1483_v35, %v979_v7  ;;  %1492 = vrcp.f32 %v1844_v5  ;;  %v642_v33 = vor.u32 1.1754944e-38, %v641_v56 }
  0xbd   : > { %v988_v17 = vsel %vm1809_vm15, %v987_v48, %v983_v13  ;;  %v634_v23 = vadd.f32 %v1487_v54, %v633_v14  ;;  %v753_v25 = vmul.f32 %v1489_v3, %v752_v16  ;;  %v1491_v26 = vpop.eup %1490  ;;  %vm1865_vm11 = vcmp.eq.f32.partialorder %v759_v4, 8.507059e+37  ;;  %v434_v48 = vpop.f32.mrf.mxu1 }
  0xbe   : > { %v1143_v63 = vpack.c.bf16 %v1111_v11, %v1111_v11  ;;  %v1119_v22 = vmul.f32 %v988_v17, %v1722_v34  ;;  %v762_v30 = vor.u32 1.1754944e-38, %v761_v60  ;;  %vm875_vm12 = vweird.f32 %v1829_v58  ;;  %v474_v11 = vpop.f32.mrf.mxu3 }
  0xbf   : > { %v638_v34 = vsel %vm637_vm10, %v1487_v54, %v634_v23  ;;  %v754_v32 = vadd.f32 %v1489_v3, %v753_v25  ;;  %v871_v35 = vmul.f32 %v1491_v26, %v1829_v58  ;;  %vm876_vm14 = vweird.f32 %v1491_v26 }
  0xc0   : > { %1176 = vst.msk [vmem:[%s1824_s30 + $0x40] sm:$0xf] %vm1159_vm8, %v1143_v63  ;;  %v1151_v31 = vpack.c.bf16 %v1119_v22, %v1119_v22  ;;  %v643_v18 = vsel %vm1832_vm3, %v642_v33, %v638_v34  ;;  %vm1878_vm15 = vcmp.eq.f32.partialorder %v879_v20, 8.507059e+37  ;;  %v882_v40 = vor.u32 1.1754944e-38, %v881_v21  ;;  %vm877_vm1 = vmor %vm875_vm12, %vm876_vm14  ;;  %v417_v20 = vpop.f32.mrf.mxu0 }
  0xc1   : > { %v1096_v41 = vmul.f32 %v643_v18, %v1725_v37  ;;  %v758_v42 = vsel %vm757_vm13, %v1489_v3, %v754_v32  ;;  %v872_v43 = vsub.f32 1.0, %v871_v35  ;;  %1494 = vpow2.f32 %v1777_v12 }
  0xc2   : > { %1184 = vst.msk [vmem:[%s1824_s30 + $0x60] sm:$0xf] %vm1159_vm8, %v1151_v31  ;;  %v1493_v46 = vpop.eup %1492  ;;  %v763_v19 = vsel %vm1865_vm11, %v762_v30, %v758_v42  ;;  %1496 = vpow2.f32 %v1781_v15  ;;  %v1394_v47 = vmul.f32 -1.442695, %v1817_v50  ;;  %v1891_v45 = vadd.f32 %v1708_v24, %v472_v36 }
  0xc3   : > { %v1128_v51 = vpack.c.bf16 %v1096_v41, %v1096_v41  ;;  %v1104_v37 = vmul.f32 %v763_v19, %v1728_v38  ;;  %v873_v52 = vmul.f32 %v1491_v26, %v872_v43  ;;  %v991_v12 = vmul.f32 %v1493_v46, %v1844_v5  ;;  %v454_v38 = vpop.f32.mrf.mxu2 }
  0xc4   : > { %vm995_vm0 = vweird.f32 %v1844_v5  ;;  %1498 = vpow2.f32 %v1394_v47  ;;  %v1402_v53 = vmul.f32 -1.442695, %v1891_v45  ;;  %v1898_v15 = vadd.f32 %v1708_v24, %v414_v44 }
  0xc5   : > { %1161 = vst.msk [vmem:[%s1824_s30 + $0x4] sm:$0xf] %vm1159_vm8, %v1128_v51  ;;  %v1136_v27 = vpack.c.bf16 %v1104_v37, %v1104_v37  ;;  %v874_v54 = vadd.f32 %v1491_v26, %v873_v52  ;;  %v992_v55 = vsub.f32 1.0, %v991_v12  ;;  %v1903_v56 = vadd.f32 %v1708_v24, %v434_v48 }
  0xc6   : > { %v999_v59 = vand.u32 2147483647, %v1844_v5  ;;  %v1001_v62 = vand.u32 2147483648, %v1844_v5  ;;  %1500 = vpow2.f32 %v1402_v53  ;;  %v1379_v1 = vmul.f32 -1.442695, %v1898_v15 }
  0xc7   : > { %v1495_v2 = vpop.eup %1494  ;;  %1169 = vst.msk [vmem:[%s1824_s30 + $0x24] sm:$0xf] %vm1159_vm8, %v1136_v27  ;;  %v878_v28 = vsel %vm877_vm1, %v1491_v26, %v874_v54  ;;  %v993_v3 = vmul.f32 %v1493_v46, %v992_v55  ;;  %vm996_vm2 = vweird.f32 %v1493_v46  ;;  %v1387_v4 = vmul.f32 -1.442695, %v1903_v56 }
  0xc8   : > { %v1497_v6 = vpop.eup %1496  ;;  %v883_v58 = vsel %vm1878_vm15, %v882_v40, %v878_v28  ;;  %v1916_v7 = vadd.f32 1.0, %v1495_v2  ;;  %1502 = vpow2.f32 %v1379_v1  ;;  %v1919_v8 = vadd.f32 %v1708_v24, %v454_v38  ;;  %vm997_vm3 = vmor %vm995_vm0, %vm996_vm2 }
  0xc9   : > { %v1112_v9 = vmul.f32 %v883_v58, %v1741_v49  ;;  %v994_v10 = vadd.f32 %v1493_v46, %v993_v3  ;;  %v1922_v60 = vadd.f32 1.0, %v1497_v6  ;;  %1504 = vpow2.f32 %v1387_v4 }
  0xca   : > { %v1499_v13 = vpop.eup %1498  ;;  %v1002_v14 = vor.u32 1.1754944e-38, %v1001_v62  ;;  %1506 = vrcp.f32 %v1916_v7  ;;  %vm1000_vm4 = vcmp.eq.f32.partialorder %v999_v59, 8.507059e+37  ;;  %v654_v63 = vand.u32 2147483647, %v1916_v7  ;;  %v477_v62 = vpop.f32.mrf.mxu3 }
  0xcb   : > { %v1144_v16 = vpack.c.bf16 %v1112_v9, %v1112_v9  ;;  %v998_v17 = vsel %vm997_vm3, %v1493_v46, %v994_v10  ;;  %1508 = vrcp.f32 %v1922_v60  ;;  %v1395_v22 = vmul.f32 -1.442695, %v1919_v8 }
  0xcc   : > { %v1501_v49 = vpop.eup %1500  ;;  %v1003_v21 = vsel %vm1000_vm4, %v1002_v14, %v998_v17  ;;  %v1931_v23 = vadd.f32 %v1708_v24, %v474_v11  ;;  %v656_v25 = vand.u32 2147483648, %v1916_v7  ;;  %v1937_v26 = vadd.f32 1.0, %v1499_v13 }
  0xcd   : > { %1177 = vst.msk [vmem:[%s1824_s30 + $0x44] sm:$0xf] %vm1159_vm8, %v1144_v16  ;;  %v1120_v5 = vmul.f32 %v1003_v21, %v1748_v57  ;;  %v1939_v33 = vadd.f32 1.0, %v1501_v49  ;;  %v774_v30 = vand.u32 2147483647, %v1922_v60  ;;  %v776_v31 = vand.u32 2147483648, %v1922_v60 }
  0xce   : > { %v1503_v29 = vpop.eup %1502  ;;  %v1944_v34 = vadd.f32 %v1708_v24, %v417_v20  ;;  %1510 = vrcp.f32 %v1937_v26  ;;  %vm650_vm5 = vweird.f32 %v1916_v7  ;;  %vm770_vm6 = vweird.f32 %v1922_v60 }
  0xcf   : > { %v1505_v32 = vpop.eup %1504  ;;  %v1152_v35 = vpack.c.bf16 %v1120_v5, %v1120_v5  ;;  %1512 = vrcp.f32 %v1939_v33  ;;  %v1403_v36 = vmul.f32 -1.442695, %v1931_v23  ;;  %vm1954_vm7 = vcmp.eq.f32.partialorder %v654_v63, 8.507059e+37 }
  0xd0   : > { %v1507_v57 = vpop.eup %1506  ;;  %v657_v41 = vor.u32 1.1754944e-38, %v656_v25  ;;  %1514 = vpow2.f32 %v1395_v22  ;;  %vm1959_vm9 = vcmp.eq.f32.partialorder %v774_v30, 8.507059e+37  ;;  %v777_v44 = vor.u32 1.1754944e-38, %v776_v31 }
  0xd1   : > { %v1509_v18 = vpop.eup %1508  ;;  %1185 = vst.msk [vmem:[%s1824_s30 + $0x64] sm:$0xf] %vm1159_vm8, %v1152_v35  ;;  %v646_v39 = vmul.f32 %v1507_v57, %v1916_v7  ;;  %v894_v46 = vand.u32 2147483647, %v1937_v26  ;;  %v1965_v19 = vmul.f32 -1.442695, %v1944_v34  ;;  %vm890_vm10 = vweird.f32 %v1937_v26  ;;  %v437_v35 = vpop.f32.mrf.mxu1 }
  0xd2   : > { %v766_v42 = vmul.f32 %v1509_v18, %v1922_v60  ;;  %v896_v48 = vand.u32 2147483648, %v1937_v26  ;;  %v1014_v51 = vand.u32 2147483647, %v1939_v33  ;;  %v1969_v37 = vadd.f32 1.0, %v1503_v29 }
  0xd3   : > { %v647_v47 = vsub.f32 1.0, %v646_v39  ;;  %v1016_v12 = vand.u32 2147483648, %v1939_v33  ;;  %v1973_v53 = vadd.f32 1.0, %v1505_v32  ;;  %1516 = vpow2.f32 %v1403_v36 }
  0xd4   : > { %v767_v52 = vsub.f32 1.0, %v766_v42  ;;  %v1511_v27 = vpop.eup %1510  ;;  %vm651_vm11 = vweird.f32 %v1507_v57  ;;  %vm1010_vm12 = vweird.f32 %v1939_v33  ;;  %1518 = vrcp.f32 %v1969_v37 }
  0xd5   : > { %v648_v54 = vmul.f32 %v1507_v57, %v647_v47  ;;  %v1513_v55 = vpop.eup %1512  ;;  %vm771_vm13 = vweird.f32 %v1509_v18  ;;  %v886_v59 = vmul.f32 %v1511_v27, %v1937_v26  ;;  %vm1978_vm14 = vcmp.eq.f32.partialorder %v894_v46, 8.507059e+37  ;;  %vm652_vm0 = vmor %vm650_vm5, %vm651_vm11 }
  0xd6   : > { %v768_v38 = vmul.f32 %v1509_v18, %v767_v52  ;;  %v1515_v1 = vpop.eup %1514  ;;  %v897_v28 = vor.u32 1.1754944e-38, %v896_v48  ;;  %v1006_v3 = vmul.f32 %v1513_v55, %v1939_v33  ;;  %vm1983_vm15 = vcmp.eq.f32.partialorder %v1014_v51, 8.507059e+37  ;;  %vm772_vm1 = vmor %vm770_vm6, %vm771_vm13 }
  0xd7   : > { %v649_v2 = vadd.f32 %v1507_v57, %v648_v54  ;;  %v887_v58 = vsub.f32 1.0, %v886_v59  ;;  %v1017_v9 = vor.u32 1.1754944e-38, %v1016_v12  ;;  %1520 = vrcp.f32 %v1973_v53 }
  0xd8   : > { %v769_v6 = vadd.f32 %v1509_v18, %v768_v38  ;;  %vm891_vm2 = vweird.f32 %v1511_v27  ;;  %v1007_v11 = vsub.f32 1.0, %v1006_v3  ;;  %v669_v13 = vand.u32 2147483647, %v1969_v37 }
  0xd9   : > { %v653_v10 = vsel %vm652_vm0, %v1507_v57, %v649_v2  ;;  %v1517_v14 = vpop.eup %1516  ;;  %v888_v7 = vmul.f32 %v1511_v27, %v887_v58  ;;  %v671_v20 = vand.u32 2147483648, %v1969_v37  ;;  %vm1011_vm3 = vweird.f32 %v1513_v55  ;;  %vm892_vm4 = vmor %vm890_vm10, %vm891_vm2  ;;  %v419_v58 = vpop.f32.mrf.mxu0 }
  0xda   : > { %v658_v16 = vsel %vm1954_vm7, %v657_v41, %v653_v10  ;;  %v773_v17 = vsel %vm772_vm1, %v1509_v18, %v769_v6  ;;  %v1519_v49 = vpop.eup %1518  ;;  %v1008_v60 = vmul.f32 %v1513_v55, %v1007_v11  ;;  %v789_v29 = vand.u32 2147483647, %v1973_v53  ;;  %vm1012_vm5 = vmor %vm1010_vm12, %vm1011_vm3 }
  0xdb   : > { %v1097_v21 = vmul.f32 %v658_v16, %v1754_v61  ;;  %v778_v63 = vsel %vm1959_vm9, %v777_v44, %v773_v17  ;;  %v889_v5 = vadd.f32 %v1511_v27, %v888_v7  ;;  %v661_v25 = vmul.f32 %v1519_v49, %v1969_v37  ;;  %v457_v44 = vpop.f32.mrf.mxu2 }
  0xdc   : > { %v1105_v22 = vmul.f32 %v778_v63, %v1761_v0  ;;  %v1009_v61 = vadd.f32 %v1513_v55, %v1008_v60  ;;  %v791_v31 = vand.u32 2147483648, %v1973_v53  ;;  %v2006_v32 = vadd.f32 1.0, %v1515_v1 }
  0xdd   : > { %v1129_v30 = vpack.c.bf16 %v1097_v21, %v1097_v21  ;;  %v1521_v57 = vpop.eup %1520  ;;  %v893_v36 = vsel %vm892_vm4, %v1511_v27, %v889_v5  ;;  %v662_v18 = vsub.f32 1.0, %v661_v25  ;;  %v2010_v39 = vadd.f32 1.0, %v1517_v14 }
  0xde   : > { %v1137_v0 = vpack.c.bf16 %v1105_v22, %v1105_v22  ;;  %v898_v26 = vsel %vm1978_vm14, %v897_v28, %v893_v36  ;;  %v1013_v40 = vsel %vm1012_vm5, %v1513_v55, %v1009_v61  ;;  %vm666_vm6 = vweird.f32 %v1519_v49 }
  0xdf   : > { %1162 = vst.msk [vmem:[%s1824_s30 + $0x8] sm:$0xf] %vm1159_vm8, %v1129_v30  ;;  %v781_v41 = vmul.f32 %v1521_v57, %v1973_v53  ;;  %v1113_v42 = vmul.f32 %v898_v26, %v1817_v50  ;;  %v1018_v33 = vsel %vm1983_vm15, %v1017_v9, %v1013_v40  ;;  %v663_v43 = vmul.f32 %v1519_v49, %v662_v18  ;;  %v439_v9 = vpop.f32.mrf.mxu1 }
  0xe0   : > { %1170 = vst.msk [vmem:[%s1824_s30 + $0x28] sm:$0xf] %vm1159_vm8, %v1137_v0  ;;  %1522 = vrcp.f32 %v2006_v32  ;;  %v1121_v46 = vmul.f32 %v1018_v33, %v1891_v45  ;;  %vm665_vm7 = vweird.f32 %v1969_v37  ;;  %v2026_v48 = vadd.f32 %v1708_v24, %v437_v35 }
  0xe1   : > { %v782_v47 = vsub.f32 1.0, %v781_v41  ;;  %v1145_v51 = vpack.c.bf16 %v1113_v42, %v1113_v42  ;;  %v664_v52 = vadd.f32 %v1519_v49, %v663_v43  ;;  %vm670_vm9 = vcmp.eq.f32.partialorder %v669_v13, 8.507059e+37  ;;  %vm667_vm10 = vmor %vm665_vm7, %vm666_vm6 }
  0xe2   : > { %1524 = vrcp.f32 %v2010_v39  ;;  %v1153_v50 = vpack.c.bf16 %v1121_v46, %v1121_v46  ;;  %v672_v12 = vor.u32 1.1754944e-38, %v671_v20  ;;  %vm786_vm11 = vweird.f32 %v1521_v57 }
  0xe3   : > { %v783_v27 = vmul.f32 %v1521_v57, %v782_v47  ;;  %1178 = vst.msk [vmem:[%s1824_s30 + $0x48] sm:$0xf] %vm1159_vm8, %v1145_v51  ;;  %v668_v45 = vsel %vm667_vm10, %v1519_v49, %v664_v52  ;;  %vm785_vm12 = vweird.f32 %v1973_v53  ;;  %vm2033_vm13 = vcmp.eq.f32.partialorder %v789_v29, 8.507059e+37  ;;  %v459_v60 = vpop.f32.mrf.mxu2 }
  0xe4   : > { %v792_v54 = vor.u32 1.1754944e-38, %v791_v31  ;;  %1186 = vst.msk [vmem:[%s1824_s30 + $0x68] sm:$0xf] %vm1159_vm8, %v1153_v50  ;;  %v673_v55 = vsel %vm670_vm9, %v672_v12, %v668_v45  ;;  %vm905_vm14 = vweird.f32 %v2006_v32  ;;  %1526 = vpow2.f32 %v1965_v19  ;;  %vm787_vm15 = vmor %vm785_vm12, %vm786_vm11 }
  0xe5   : > { %v784_v38 = vadd.f32 %v1521_v57, %v783_v27  ;;  %v1388_v59 = vmul.f32 -1.442695, %v2026_v48  ;;  %v1098_v2 = vmul.f32 %v673_v55, %v1898_v15  ;;  %v909_v53 = vand.u32 2147483647, %v2006_v32 }
  0xe6   : > { %v1523_v1 = vpop.eup %1522  ;;  %v911_v28 = vand.u32 2147483648, %v2006_v32  ;;  %v2047_v3 = vadd.f32 %v1708_v24, %v457_v44  ;;  %v1029_v19 = vand.u32 2147483647, %v2010_v39  ;;  %v2055_v14 = vadd.f32 %v1708_v24, %v477_v62  ;;  %v479_v44 = vpop.f32.mrf.mxu3 }
  0xe7   : > { %v788_v4 = vsel %vm787_vm15, %v1521_v57, %v784_v38  ;;  %v901_v6 = vmul.f32 %v1523_v1, %v2006_v32  ;;  %1528 = vpow2.f32 %v1388_v59  ;;  %v1130_v15 = vpack.c.bf16 %v1098_v2, %v1098_v2 }
  0xe8   : > { %v1525_v10 = vpop.eup %1524  ;;  %v793_v11 = vsel %vm2033_vm13, %v792_v54, %v788_v4  ;;  %v1396_v13 = vmul.f32 -1.442695, %v2047_v3  ;;  %v1031_v20 = vand.u32 2147483648, %v2010_v39  ;;  %v1404_v49 = vmul.f32 -1.442695, %v2055_v14 }
  0xe9   : > { %v1106_v16 = vmul.f32 %v793_v11, %v1903_v56  ;;  %v902_v17 = vsub.f32 1.0, %v901_v6  ;;  %v1021_v7 = vmul.f32 %v1525_v10, %v2010_v39  ;;  %1163 = vst.msk [vmem:[%s1824_s30 + $0xc] sm:$0xf] %vm1159_vm8, %v1130_v15  ;;  %v2064_v21 = vadd.f32 %v1708_v24, %v419_v58 }
  0xea   : > { %1530 = vpow2.f32 %v1396_v13  ;;  %v2067_v63 = vadd.f32 %v1708_v24, %v439_v9  ;;  %v1527_v22 = vpop.eup %1526  ;;  %vm906_vm0 = vweird.f32 %v1523_v1  ;;  %vm1026_vm1 = vweird.f32 %v1525_v10 }
  0xeb   : > { %v1138_v56 = vpack.c.bf16 %v1106_v16, %v1106_v16  ;;  %v903_v5 = vmul.f32 %v1523_v1, %v902_v17  ;;  %v1022_v25 = vsub.f32 1.0, %v1021_v7  ;;  %v2069_v29 = vadd.f32 1.0, %v1527_v22  ;;  %vm907_vm2 = vmor %vm905_vm14, %vm906_vm0 }
  0xec   : > { %1532 = vpow2.f32 %v1404_v49  ;;  %v1381_v30 = vmul.f32 -1.442695, %v2064_v21  ;;  %v1389_v61 = vmul.f32 -1.442695, %v2067_v63  ;;  %v2076_v0 = vadd.f32 %v1708_v24, %v459_v60 }
  0xed   : > { %v1529_v31 = vpop.eup %1528  ;;  %1171 = vst.msk [vmem:[%s1824_s30 + $0x2c] sm:$0xf] %vm1159_vm8, %v1138_v56  ;;  %v904_v35 = vadd.f32 %v1523_v1, %v903_v5  ;;  %v1023_v57 = vmul.f32 %v1525_v10, %v1022_v25  ;;  %vm910_vm3 = vcmp.eq.f32.partialorder %v909_v53, 8.507059e+37  ;;  %v912_v36 = vor.u32 1.1754944e-38, %v911_v28 }
  0xee   : > { %vm1025_vm4 = vweird.f32 %v2010_v39  ;;  %1534 = vrcp.f32 %v2069_v29  ;;  %v2082_v40 = vadd.f32 1.0, %v1529_v31  ;;  %vm1030_vm6 = vcmp.eq.f32.partialorder %v1029_v19, 8.507059e+37 }
  0xef   : > { %v908_v18 = vsel %vm907_vm2, %v1523_v1, %v904_v35  ;;  %v1024_v26 = vadd.f32 %v1525_v10, %v1023_v57  ;;  %1536 = vpow2.f32 %v1381_v30  ;;  %vm1027_vm5 = vmor %vm1025_vm4, %vm1026_vm1  ;;  %v1032_v33 = vor.u32 1.1754944e-38, %v1031_v20 }
  0xf0   : > { %v1531_v41 = vpop.eup %1530  ;;  %v913_v42 = vsel %vm910_vm3, %v912_v36, %v908_v18  ;;  %1538 = vpow2.f32 %v1389_v61  ;;  %v1397_v39 = vmul.f32 -1.442695, %v2076_v0  ;;  %v684_v51 = vand.u32 2147483647, %v2069_v29 }
  0xf1   : > { %v1114_v32 = vmul.f32 %v913_v42, %v1919_v8  ;;  %v1028_v43 = vsel %vm1027_vm5, %v1525_v10, %v1024_v26  ;;  %1540 = vrcp.f32 %v2082_v40  ;;  %v686_v52 = vand.u32 2147483648, %v2069_v29 }
  0xf2   : > { %v1533_v46 = vpop.eup %1532  ;;  %v1033_v47 = vsel %vm1030_vm6, %v1032_v33, %v1028_v43  ;;  %v2089_v50 = vadd.f32 1.0, %v1531_v41  ;;  %v804_v37 = vand.u32 2147483647, %v2082_v40  ;;  %v806_v54 = vand.u32 2147483648, %v2082_v40 }
  0xf3   : > { %v1146_v12 = vpack.c.bf16 %v1114_v32, %v1114_v32  ;;  %v1122_v27 = vmul.f32 %v1033_v47, %v1931_v23  ;;  %v2092_v45 = vadd.f32 1.0, %v1533_v46  ;;  %v2098_v55 = vadd.f32 %v1708_v24, %v479_v44 }
  0xf4   : > { %v1535_v8 = vpop.eup %1534  ;;  %1542 = vrcp.f32 %v2089_v50  ;;  %vm680_vm7 = vweird.f32 %v2069_v29  ;;  %vm2104_vm9 = vcmp.eq.f32.partialorder %v684_v51, 8.507059e+37  ;;  %v687_v2 = vor.u32 1.1754944e-38, %v686_v52 }
  0xf5   : > { %v1537_v38 = vpop.eup %1536  ;;  %1179 = vst.msk [vmem:[%s1824_s30 + $0x4c] sm:$0xf] %vm1159_vm8, %v1146_v12  ;;  %v1154_v59 = vpack.c.bf16 %v1122_v27, %v1122_v27  ;;  %v676_v62 = vmul.f32 %v1535_v8, %v2069_v29  ;;  %1544 = vpow2.f32 %v1397_v39  ;;  %v924_v53 = vand.u32 2147483647, %v2089_v50  ;;  %v422_v27 = vpop.f32.mrf.mxu0 }
  0xf6   : > { %v1539_v23 = vpop.eup %1538  ;;  %1546 = vrcp.f32 %v2092_v45  ;;  %vm800_vm10 = vweird.f32 %v2082_v40  ;;  %v926_v4 = vand.u32 2147483648, %v2089_v50  ;;  %v2114_v6 = vadd.f32 1.0, %v1537_v38 }
  0xf7   : > { %v1541_v24 = vpop.eup %1540  ;;  %1187 = vst.msk [vmem:[%s1824_s30 + $0x6c] sm:$0xf] %vm1159_vm8, %v1154_v59  ;;  %v677_v28 = vsub.f32 1.0, %v676_v62  ;;  %vm2117_vm11 = vcmp.eq.f32.partialorder %v804_v37, 8.507059e+37  ;;  %v807_v9 = vor.u32 1.1754944e-38, %v806_v54  ;;  %v1046_v10 = vand.u32 2147483648, %v2092_v45 }
  0xf8   : > { %v796_v19 = vmul.f32 %v1541_v24, %v2082_v40  ;;  %vm681_vm12 = vweird.f32 %v1535_v8  ;;  %v1044_v11 = vand.u32 2147483647, %v2092_v45  ;;  %1548 = vrcp.f32 %v2114_v6 }
  0xf9   : > { %v678_v15 = vmul.f32 %v1535_v8, %v677_v28  ;;  %vm920_vm13 = vweird.f32 %v2089_v50  ;;  %v701_v17 = vand.u32 2147483648, %v2114_v6  ;;  %v2126_v7 = vadd.f32 1.0, %v1539_v23  ;;  %vm682_vm1 = vmor %vm680_vm7, %vm681_vm12 }
  0xfa   : > { %v1543_v13 = vpop.eup %1542  ;;  %v797_v16 = vsub.f32 1.0, %v796_v19  ;;  %vm801_vm14 = vweird.f32 %v1541_v24  ;;  %vm2129_vm15 = vcmp.eq.f32.partialorder %v924_v53, 8.507059e+37  ;;  %v927_v56 = vor.u32 1.1754944e-38, %v926_v4  ;;  %v462_v53 = vpop.f32.mrf.mxu2 }
  0xfb   : > { %v1545_v20 = vpop.eup %1544  ;;  %v679_v49 = vadd.f32 %v1535_v8, %v678_v15  ;;  %v916_v60 = vmul.f32 %v1543_v13, %v2089_v50  ;;  %vm1040_vm0 = vweird.f32 %v2092_v45  ;;  %v1047_v30 = vor.u32 1.1754944e-38, %v1046_v10  ;;  %vm802_vm5 = vmor %vm800_vm10, %vm801_vm14 }
  0xfc   : > { %v1547_v5 = vpop.eup %1546  ;;  %v798_v25 = vmul.f32 %v1541_v24, %v797_v16  ;;  %v699_v61 = vand.u32 2147483647, %v2114_v6  ;;  %1550 = vrcp.f32 %v2126_v7  ;;  %vm921_vm2 = vweird.f32 %v1543_v13 }
  0xfd   : > { %v683_v31 = vsel %vm682_vm1, %v1535_v8, %v679_v49  ;;  %v917_v35 = vsub.f32 1.0, %v916_v60  ;;  %v1036_v57 = vmul.f32 %v1547_v5, %v2092_v45  ;;  %vm2140_vm3 = vcmp.eq.f32.partialorder %v1044_v11, 8.507059e+37  ;;  %v442_v8 = vpop.f32.mrf.mxu1  ;;  %v1590_v49 = vld [vmem:[%s2366_s2] ss:$0 sm:$0xff]  ;;  %v424_v36 = vpop.f32.mrf.mxu0 }
  0xfe   : > { %v688_v18 = vsel %vm2104_vm9, %v687_v2, %v683_v31  ;;  %v799_v29 = vadd.f32 %v1541_v24, %v798_v25  ;;  %vm695_vm4 = vweird.f32 %v2114_v6  ;;  %v702_v26 = vor.u32 1.1754944e-38, %v701_v17  ;;  %v1549_v42 = vpop.eup %1548  ;;  %vm922_vm9 = vmor %vm920_vm13, %vm921_vm2 }
  0xff   : > { %v2147_v41 = vadd.f32 1.0, %v1545_v20  ;;  %v1099_v33 = vmul.f32 %v688_v18, %v1944_v34  ;;  %v918_v32 = vmul.f32 %v1543_v13, %v917_v35  ;;  %v1037_v43 = vsub.f32 1.0, %v1036_v57 }
 0x100   : > { %vm1041_vm6 = vweird.f32 %v1547_v5  ;;  %v803_v39 = vsel %vm802_vm5, %v1541_v24, %v799_v29  ;;  %v691_v44 = vmul.f32 %v1549_v42, %v2114_v6  ;;  %vm2154_vm7 = vcmp.eq.f32.partialorder %v699_v61, 8.507059e+37 }
 0x101   : > { %v819_v47 = vand.u32 2147483647, %v2126_v7  ;;  %v821_v51 = vand.u32 2147483648, %v2126_v7  ;;  %v1131_v34 = vpack.c.bf16 %v1099_v33, %v1099_v33  ;;  %v808_v40 = vsel %vm2117_vm11, %v807_v9, %v803_v39  ;;  %vm1042_vm12 = vmor %vm1040_vm0, %vm1041_vm6 }
 0x102   : > { %v919_v52 = vadd.f32 %v1543_v13, %v918_v32  ;;  %v1038_v12 = vmul.f32 %v1547_v5, %v1037_v43  ;;  %v1551_v37 = vpop.eup %1550  ;;  %v1107_v54 = vmul.f32 %v808_v40, %v2026_v48  ;;  %v692_v38 = vsub.f32 1.0, %v691_v44  ;;  %v464_v46 = vpop.f32.mrf.mxu2 }
 0x103   : > { %vm815_vm10 = vweird.f32 %v2126_v7  ;;  %1552 = vrcp.f32 %v2147_v41  ;;  %1164 = vst.msk [vmem:[%s1824_s30 + $0x10] sm:$0xf] %vm1159_vm8, %v1131_v34  ;;  %vm696_vm11 = vweird.f32 %v1549_v42  ;;  %v811_v23 = vmul.f32 %v1551_v37, %v2126_v7 }
 0x104   : > { %v923_v59 = vsel %vm922_vm9, %v1543_v13, %v919_v52  ;;  %v1039_v62 = vadd.f32 %v1547_v5, %v1038_v12  ;;  %v1139_v1 = vpack.c.bf16 %v1107_v54, %v1107_v54  ;;  %v693_v50 = vmul.f32 %v1549_v42, %v692_v38  ;;  %v482_v13 = vpop.f32.mrf.mxu3 }
 0x105   : > { %v928_v48 = vsel %vm2129_vm15, %v927_v56, %v923_v59  ;;  %vm2176_vm13 = vcmp.eq.f32.partialorder %v819_v47, 8.507059e+37  ;;  %v812_v4 = vsub.f32 1.0, %v811_v23  ;;  %v822_v19 = vor.u32 1.1754944e-38, %v821_v51  ;;  %vm697_vm15 = vmor %vm695_vm4, %vm696_vm11 }
 0x106   : > { %v1115_v24 = vmul.f32 %v928_v48, %v2047_v3  ;;  %v1043_v28 = vsel %vm1042_vm12, %v1547_v5, %v1039_v62  ;;  %1172 = vst.msk [vmem:[%s1824_s30 + $0x30] sm:$0xf] %vm1159_vm8, %v1139_v1  ;;  %v694_v9 = vadd.f32 %v1549_v42, %v693_v50  ;;  %vm816_vm14 = vweird.f32 %v1551_v37 }
 0x107   : > { %v1048_v58 = vsel %vm2140_vm3, %v1047_v30, %v1043_v28  ;;  %v1405_v45 = vmul.f32 -1.442695, %v2098_v55  ;;  %v813_v3 = vmul.f32 %v1551_v37, %v812_v4  ;;  %v939_v11 = vand.u32 2147483647, %v2147_v41  ;;  %vm817_vm0 = vmor %vm815_vm10, %vm816_vm14 }
 0x108   : > { %v1147_v10 = vpack.c.bf16 %v1115_v24, %v1115_v24  ;;  %v1123_v15 = vmul.f32 %v1048_v58, %v2055_v14  ;;  %v698_v17 = vsel %vm697_vm15, %v1549_v42, %v694_v9  ;;  %v941_v20 = vand.u32 2147483648, %v2147_v41 }
 0x109   : > { %v1553_v16 = vpop.eup %1552  ;;  %1554 = vpow2.f32 %v1405_v45  ;;  %v2195_v60 = vadd.f32 %v1590_v49, %v422_v27  ;;  %v703_v6 = vsel %vm2154_vm7, %v702_v26, %v698_v17  ;;  %v814_v22 = vadd.f32 %v1551_v37, %v813_v3 }
 0x10a   : > { %1180 = vst.msk [vmem:[%s1824_s30 + $0x50] sm:$0xf] %vm1159_vm8, %v1147_v10  ;;  %v1155_v14 = vpack.c.bf16 %v1123_v15, %v1123_v15  ;;  %v931_v56 = vmul.f32 %v1553_v16, %v2147_v41  ;;  %v1100_v5 = vmul.f32 %v703_v6, %v2064_v21  ;;  %vm936_vm1 = vweird.f32 %v1553_v16  ;;  %v444_v21 = vpop.f32.mrf.mxu1 }
 0x10b   : > { %v1382_v25 = vmul.f32 -1.442695, %v2195_v60  ;;  %v2207_v30 = vadd.f32 %v1590_v49, %v442_v8  ;;  %v818_v61 = vsel %vm817_vm0, %v1551_v37, %v814_v22  ;;  %v2211_v35 = vadd.f32 %v1590_v49, %v462_v53 }
 0x10c   : > { %1188 = vst.msk [vmem:[%s1824_s30 + $0x70] sm:$0xf] %vm1159_vm8, %v1155_v14  ;;  %v932_v31 = vsub.f32 1.0, %v931_v56  ;;  %v2213_v57 = vadd.f32 %v1590_v49, %v482_v13  ;;  %v1132_v18 = vpack.c.bf16 %v1100_v5, %v1100_v5  ;;  %v823_v7 = vsel %vm2176_vm13, %v822_v19, %v818_v61  ;;  %v484_v12 = vpop.f32.mrf.mxu3 }
 0x10d   : > { %1556 = vpow2.f32 %v1382_v25  ;;  %v1390_v29 = vmul.f32 -1.442695, %v2207_v30  ;;  %v1108_v26 = vmul.f32 %v823_v7, %v2067_v63  ;;  %v1398_v33 = vmul.f32 -1.442695, %v2211_v35 }
 0x10e   : > { %v933_v42 = vmul.f32 %v1553_v16, %v932_v31  ;;  %v1406_v32 = vmul.f32 -1.442695, %v2213_v57  ;;  %1165 = vst.msk [vmem:[%s1824_s30 + $0x14] sm:$0xf] %vm1159_vm8, %v1132_v18  ;;  %vm935_vm2 = vweird.f32 %v2147_v41  ;;  %v2224_v39 = vadd.f32 %v1590_v49, %v424_v36 }
 0x10f   : > { %v1555_v43 = vpop.eup %1554  ;;  %1558 = vpow2.f32 %v1390_v29  ;;  %v2226_v44 = vadd.f32 %v1590_v49, %v444_v21  ;;  %v1140_v47 = vpack.c.bf16 %v1108_v26, %v1108_v26  ;;  %vm937_vm3 = vmor %vm935_vm2, %vm936_vm1  ;;  %v942_v34 = vor.u32 1.1754944e-38, %v941_v20 }
 0x110   : > { %v934_v51 = vadd.f32 %v1553_v16, %v933_v42  ;;  %v2228_v63 = vadd.f32 1.0, %v1555_v43  ;;  %1560 = vpow2.f32 %v1398_v33  ;;  %v1383_v40 = vmul.f32 -1.442695, %v2224_v39 }
 0x111   : > { %1562 = vpow2.f32 %v1406_v32  ;;  %1173 = vst.msk [vmem:[%s1824_s30 + $0x34] sm:$0xf] %vm1159_vm8, %v1140_v47  ;;  %vm940_vm4 = vcmp.eq.f32.partialorder %v939_v11, 8.507059e+37  ;;  %v2235_v52 = vadd.f32 %v1590_v49, %v464_v46  ;;  %v1391_v38 = vmul.f32 -1.442695, %v2226_v44 }
 0x112   : > { %v938_v41 = vsel %vm937_vm3, %v1553_v16, %v934_v51  ;;  %1564 = vrcp.f32 %v2228_v63  ;;  %v2241_v62 = vadd.f32 %v1590_v49, %v484_v12  ;;  %v1059_v2 = vand.u32 2147483647, %v2228_v63 }
 0x113   : > { %v1557_v27 = vpop.eup %1556  ;;  %v943_v8 = vsel %vm940_vm4, %v942_v34, %v938_v41  ;;  %1566 = vpow2.f32 %v1383_v40  ;;  %v1399_v48 = vmul.f32 -1.442695, %v2235_v52  ;;  %vm1055_vm5 = vweird.f32 %v2228_v63 }
 0x114   : > { %v1116_v37 = vmul.f32 %v943_v8, %v2076_v0  ;;  %v2238_v54 = vadd.f32 1.0, %v1557_v27  ;;  %v1061_v0 = vand.u32 2147483648, %v2228_v63  ;;  %v1407_v58 = vmul.f32 -1.442695, %v2241_v62 }
 0x115   : > { %v1559_v59 = vpop.eup %1558  ;;  %vm2262_vm6 = vcmp.eq.f32.partialorder %v1059_v2, 8.507059e+37 }
 0x116   : > { %v1561_v23 = vpop.eup %1560  ;;  %v1148_v1 = vpack.c.bf16 %v1116_v37, %v1116_v37  ;;  %1568 = vrcp.f32 %v2238_v54  ;;  %v2247_v53 = vadd.f32 1.0, %v1559_v59  ;;  %v714_v9 = vand.u32 2147483647, %v2238_v54 }
 0x117   : > { %v1563_v50 = vpop.eup %1562  ;;  %v2249_v24 = vadd.f32 1.0, %v1561_v23  ;;  %1570 = vpow2.f32 %v1391_v38  ;;  %v716_v45 = vand.u32 2147483648, %v2238_v54  ;;  %v1062_v11 = vor.u32 1.1754944e-38, %v1061_v0 }
 0x118   : > { %v1565_v28 = vpop.eup %1564  ;;  %1181 = vst.msk [vmem:[%s1824_s30 + $0x54] sm:$0xf] %vm1159_vm8, %v1148_v1  ;;  %v2253_v4 = vadd.f32 1.0, %v1563_v50  ;;  %1572 = vrcp.f32 %v2247_v53  ;;  %vm710_vm7 = vweird.f32 %v2238_v54  ;;  %v834_v16 = vand.u32 2147483647, %v2247_v53 }
 0x119   : > { %v1051_v19 = vmul.f32 %v1565_v28, %v2228_v63  ;;  %1574 = vrcp.f32 %v2249_v24  ;;  %v1567_v10 = vpop.eup %1566  ;;  %v836_v17 = vand.u32 2147483648, %v2247_v53  ;;  %vm1056_vm9 = vweird.f32 %v1565_v28 }
 0x11a   : > { %1576 = vpow2.f32 %v1399_v48  ;;  %vm2271_vm10 = vcmp.eq.f32.partialorder %v714_v9, 8.507059e+37  ;;  %v717_v22 = vor.u32 1.1754944e-38, %v716_v45  ;;  %vm830_vm11 = vweird.f32 %v2247_v53  ;;  %vm1057_vm13 = vmor %vm1055_vm5, %vm1056_vm9 }
 0x11b   : > { %v1052_v15 = vsub.f32 1.0, %v1051_v19  ;;  %1578 = vrcp.f32 %v2253_v4  ;;  %v2276_v56 = vadd.f32 1.0, %v1567_v10  ;;  %vm950_vm12 = vweird.f32 %v2249_v24 }
 0x11c   : > { %v1569_v13 = vpop.eup %1568  ;;  %1580 = vpow2.f32 %v1407_v58  ;;  %v954_v31 = vand.u32 2147483647, %v2249_v24  ;;  %vm2283_vm14 = vcmp.eq.f32.partialorder %v834_v16, 8.507059e+37  ;;  %v837_v7 = vor.u32 1.1754944e-38, %v836_v17 }
 0x11d   : > { %v1053_v20 = vmul.f32 %v1565_v28, %v1052_v15  ;;  %v706_v49 = vmul.f32 %v1569_v13, %v2238_v54  ;;  %v1571_v14 = vpop.eup %1570  ;;  %v956_v29 = vand.u32 2147483648, %v2249_v24  ;;  %vm711_vm15 = vweird.f32 %v1569_v13 }
 0x11e   : > { %v1573_v5 = vpop.eup %1572  ;;  %vm1070_vm0 = vweird.f32 %v2253_v4  ;;  %1582 = vrcp.f32 %v2276_v56  ;;  %v2293_v51 = vadd.f32 1.0, %v1571_v14  ;;  %vm712_vm1 = vmor %vm710_vm7, %vm711_vm15  ;;  %v1074_v8 = vand.u32 2147483647, %v2253_v4 }
 0x11f   : > { %v1054_v25 = vadd.f32 %v1565_v28, %v1053_v20  ;;  %v707_v61 = vsub.f32 1.0, %v706_v49  ;;  %v1575_v36 = vpop.eup %1574  ;;  %v826_v21 = vmul.f32 %v1573_v5, %v2247_v53  ;;  %vm831_vm2 = vweird.f32 %v1573_v5 }
 0x120   : > { %v1577_v26 = vpop.eup %1576  ;;  %v946_v32 = vmul.f32 %v1575_v36, %v2249_v24  ;;  %vm951_vm3 = vweird.f32 %v1575_v36  ;;  %v1076_v48 = vand.u32 2147483648, %v2253_v4  ;;  %vm832_vm5 = vmor %vm830_vm11, %vm831_vm2  ;;  %1584 = vrcp.f32 %v2293_v51 }
 0x121   : > { %v1058_v42 = vsel %vm1057_vm13, %v1565_v28, %v1054_v25  ;;  %v708_v33 = vmul.f32 %v1569_v13, %v707_v61  ;;  %v1579_v43 = vpop.eup %1578  ;;  %v827_v47 = vsub.f32 1.0, %v826_v21  ;;  %vm955_vm7 = vcmp.eq.f32.partialorder %v954_v31, 8.507059e+37 }
 0x122   : > { %v1063_v46 = vsel %vm2262_vm6, %v1062_v11, %v1058_v42  ;;  %v1581_v63 = vpop.eup %1580  ;;  %v947_v41 = vsub.f32 1.0, %v946_v32  ;;  %v1066_v12 = vmul.f32 %v1579_v43, %v2253_v4  ;;  %vm1071_vm4 = vweird.f32 %v1579_v43  ;;  %vm952_vm6 = vmor %vm950_vm12, %vm951_vm3 }
 0x123   : > { %v1124_v34 = vmul.f32 %v1063_v46, %v2098_v55  ;;  %v709_v40 = vadd.f32 %v1569_v13, %v708_v33  ;;  %v828_v27 = vmul.f32 %v1573_v5, %v827_v47  ;;  %v957_v19 = vor.u32 1.1754944e-38, %v956_v29  ;;  %vm1072_vm9 = vmor %vm1070_vm0, %vm1071_vm4 }
 0x124   : > { %v948_v59 = vmul.f32 %v1575_v36, %v947_v41  ;;  %v1067_v23 = vsub.f32 1.0, %v1066_v12  ;;  %v1583_v0 = vpop.eup %1582  ;;  %v2312_v58 = vadd.f32 1.0, %v1577_v26  ;;  %v1077_v24 = vor.u32 1.1754944e-38, %v1076_v48 }
 0x125   : > { %v1156_v37 = vpack.c.bf16 %v1124_v34, %v1124_v34  ;;  %v713_v38 = vsel %vm712_vm1, %v1569_v13, %v709_v40  ;;  %v829_v1 = vadd.f32 %v1573_v5, %v828_v27  ;;  %v721_v3 = vmul.f32 %v1583_v0, %v2276_v56 }
 0x126   : > { %v718_v55 = vsel %vm2271_vm10, %v717_v22, %v713_v38  ;;  %v949_v50 = vadd.f32 %v1575_v36, %v948_v59  ;;  %v1068_v2 = vmul.f32 %v1579_v43, %v1067_v23  ;;  %vm1075_vm10 = vcmp.eq.f32.partialorder %v1074_v8, 8.507059e+37 }
 0x127   : > { %1189 = vst.msk [vmem:[%s1824_s30 + $0x74] sm:$0xf] %vm1159_vm8, %v1156_v37  ;;  %v1101_v54 = vmul.f32 %v718_v55, %v2195_v60  ;;  %v833_v28 = vsel %vm832_vm5, %v1573_v5, %v829_v1  ;;  %v722_v20 = vsub.f32 1.0, %v721_v3  ;;  %1586 = vrcp.f32 %v2312_v58 }
 0x128   : > { %v838_v60 = vsel %vm2283_vm14, %v837_v7, %v833_v28  ;;  %v953_v53 = vsel %vm952_vm6, %v1575_v36, %v949_v50  ;;  %v1069_v45 = vadd.f32 %v1579_v43, %v1068_v2  ;;  %v729_v14 = vand.u32 2147483647, %v2276_v56 }
 0x129   : > { %v1133_v9 = vpack.c.bf16 %v1101_v54, %v1101_v54  ;;  %v1109_v10 = vmul.f32 %v838_v60, %v2207_v30  ;;  %v958_v15 = vsel %vm955_vm7, %v957_v19, %v953_v53  ;;  %v1585_v30 = vpop.eup %1584  ;;  %v731_v6 = vand.u32 2147483648, %v2276_v56 }
 0x12a   : > { %v1117_v11 = vmul.f32 %v958_v15, %v2211_v35  ;;  %v1073_v13 = vsel %vm1072_vm9, %v1579_v43, %v1069_v45  ;;  %v723_v35 = vmul.f32 %v1583_v0, %v722_v20  ;;  %vm726_vm11 = vweird.f32 %v1583_v0 }
 0x12b   : > { %1166 = vst.msk [vmem:[%s1824_s30 + $0x18] sm:$0xf] %vm1159_vm8, %v1133_v9  ;;  %v1141_v16 = vpack.c.bf16 %v1109_v10, %v1109_v10  ;;  %v1078_v17 = vsel %vm1075_vm10, %v1077_v24, %v1073_v13  ;;  %v841_v22 = vmul.f32 %v1585_v30, %v2293_v51  ;;  %v614_v25 = vadd.f32 1.0, %v1581_v63 }
 0x12c   : > { %v1149_v4 = vpack.c.bf16 %v1117_v11, %v1117_v11  ;;  %v1125_v49 = vmul.f32 %v1078_v17, %v2213_v57  ;;  %v724_v61 = vadd.f32 %v1583_v0, %v723_v35  ;;  %vm725_vm12 = vweird.f32 %v2276_v56 }
 0x12d   : > { %1174 = vst.msk [vmem:[%s1824_s30 + $0x38] sm:$0xf] %vm1159_vm8, %v1141_v16  ;;  %v842_v31 = vsub.f32 1.0, %v841_v22  ;;  %vm727_vm13 = vmor %vm725_vm12, %vm726_vm11  ;;  %vm730_vm14 = vcmp.eq.f32.partialorder %v729_v14, 8.507059e+37  ;;  %v732_v57 = vor.u32 1.1754944e-38, %v731_v6  ;;  %v851_v36 = vand.u32 2147483648, %v2293_v51  ;;  %v1587_v21 = vpop.eup %1586 }
 0x12e   : > { %1182 = vst.msk [vmem:[%s1824_s30 + $0x58] sm:$0xf] %vm1159_vm8, %v1149_v4  ;;  %v1157_v5 = vpack.c.bf16 %v1125_v49, %v1125_v49  ;;  %1588 = vrcp.f32 %v614_v25  ;;  %v728_v18 = vsel %vm727_vm13, %v1583_v0, %v724_v61  ;;  %vm846_vm15 = vweird.f32 %v1585_v30 }
 0x12f   : > { %v843_v7 = vmul.f32 %v1585_v30, %v842_v31  ;;  %v849_v29 = vand.u32 2147483647, %v2293_v51  ;;  %v733_v26 = vsel %vm730_vm14, %v732_v57, %v728_v18  ;;  %v961_v42 = vmul.f32 %v1587_v21, %v2312_v58 }
 0x130   : > { %1190 = vst.msk [vmem:[%s1824_s30 + $0x78] sm:$0xf] %vm1159_vm8, %v1157_v5  ;;  %v1102_v56 = vmul.f32 %v733_v26, %v2224_v39  ;;  %vm845_vm0 = vweird.f32 %v2293_v51  ;;  %v852_v32 = vor.u32 1.1754944e-38, %v851_v36  ;;  %v971_v63 = vand.u32 2147483648, %v2312_v58 }
 0x131   : > { %v844_v33 = vadd.f32 %v1585_v30, %v843_v7  ;;  %vm847_vm1 = vmor %vm845_vm0, %vm846_vm15  ;;  %v962_v43 = vsub.f32 1.0, %v961_v42  ;;  %vm850_vm2 = vcmp.eq.f32.partialorder %v849_v29, 8.507059e+37  ;;  %vm966_vm3 = vweird.f32 %v1587_v21 }
 0x132   : > { %v1134_v46 = vpack.c.bf16 %v1102_v56, %v1102_v56  ;;  %v969_v12 = vand.u32 2147483647, %v2312_v58  ;;  %vm965_vm4 = vweird.f32 %v2312_v58  ;;  %v972_v37 = vor.u32 1.1754944e-38, %v971_v63 }
 0x133   : > { %v848_v47 = vsel %vm847_vm1, %v1585_v30, %v844_v33  ;;  %v963_v41 = vmul.f32 %v1587_v21, %v962_v43  ;;  %vm967_vm5 = vmor %vm965_vm4, %vm966_vm3  ;;  %v1091_v23 = vand.u32 2147483648, %v614_v25  ;;  %v1089_v48 = vand.u32 2147483647, %v614_v25 }
 0x134   : > { %v1589_v34 = vpop.eup %1588  ;;  %v853_v40 = vsel %vm850_vm2, %v852_v32, %v848_v47  ;;  %1167 = vst.msk [vmem:[%s1824_s30 + $0x1c] sm:$0xf] %vm1159_vm8, %v1134_v46  ;;  %vm970_vm6 = vcmp.eq.f32.partialorder %v969_v12, 8.507059e+37  ;;  %vm1085_vm9 = vweird.f32 %v614_v25 }
 0x135   : > { %v1110_v39 = vmul.f32 %v853_v40, %v2226_v44  ;;  %v1081_v51 = vmul.f32 %v1589_v34, %v614_v25  ;;  %v964_v27 = vadd.f32 %v1587_v21, %v963_v41  ;;  %vm1086_vm7 = vweird.f32 %v1589_v34 }
 0x136   : > { %vm1087_vm10 = vmor %vm1085_vm9, %vm1086_vm7  ;;  %v1092_v2 = vor.u32 1.1754944e-38, %v1091_v23  ;;  %vm1090_vm11 = vcmp.eq.f32.partialorder %v1089_v48, 8.507059e+37 }
 0x137   : > { %v1142_v8 = vpack.c.bf16 %v1110_v39, %v1110_v39  ;;  %v1082_v38 = vsub.f32 1.0, %v1081_v51  ;;  %v968_v59 = vsel %vm967_vm5, %v1587_v21, %v964_v27 }
 0x138   : > { %v973_v55 = vsel %vm970_vm6, %v972_v37, %v968_v59 }
 0x139   : > { %1175 = vst.msk [vmem:[%s1824_s30 + $0x3c] sm:$0xf] %vm1159_vm8, %v1142_v8  ;;  %v1083_v1 = vmul.f32 %v1589_v34, %v1082_v38  ;;  %v1118_v44 = vmul.f32 %v973_v55, %v2235_v52 }
 0x13b   : > { %v1084_v54 = vadd.f32 %v1589_v34, %v1083_v1  ;;  %v1150_v50 = vpack.c.bf16 %v1118_v44, %v1118_v44 }
 0x13d   : > { %v1088_v0 = vsel %vm1087_vm10, %v1589_v34, %v1084_v54  ;;  %1183 = vst.msk [vmem:[%s1824_s30 + $0x5c] sm:$0xf] %vm1159_vm8, %v1150_v50 }
 0x13e   : > { %v1093_v28 = vsel %vm1090_vm11, %v1092_v2, %v1088_v0 }
 0x13f   : > { %v1126_v19 = vmul.f32 %v1093_v28, %v2241_v62 }
 0x141   : > { %v1158_v58 = vpack.c.bf16 %v1126_v19, %v1126_v19 }
 0x143   : > { %1191 = vst.msk [vmem:[%s1824_s30 + $0x7c] sm:$0xf] %vm1159_vm8, %v1158_v58 }
 0x144 PF: > { %s13_s14 = sadd.s32 1, %s1613_s14   ;;  %s2410_s12 = smov %s1609_s13 }
 0x145   : > { %p10_p5 = scmp.ge.s32.totalorder %s13_s14, 4   ;;  %s2411_s13 = smov %s2413_s15 }
 0x147   :  { %12 = sbr.rel (!%p10_p5) target bundleno = 2 (0x2), region = 62 }

</bundles_post_ra>
